<compile_context>
chip_gen: v7x
topology: tpu7x:2x2x1
jax: 0.10.0
libtpu: 0.0.40
codegen_flags: <defaults>
</compile_context>

<pallas_src>
import functools

import jax
import jax.numpy as jnp
from jax.experimental import pallas as pl
from jax.experimental.pallas import tpu as pltpu


_SINGLE_BLOCK_MAX_B = 2048   # below this, one full-array block (dispatch dominates anyway)
_LANE_TILE = 2048            # lane-axis batch tile for the pipelined grid path


def _loss_kernel(pred_ref, cls_ref, act_tgt_ref, out_ref, acc_ref, *,
                 num_classes, total_b, block_b, activity_weight):
    i = pl.program_id(0)

    @pl.when(i == 0)
    def _():
        acc_ref[0, 0] = jnp.float32(0.0)

    preds = pred_ref[...].astype(jnp.float32)        # (W, TB), W = C + 2
    cls = cls_ref[...]                               # (1, TB) int32
    act_tgt = act_tgt_ref[...].astype(jnp.float32)   # (2, TB)

    W, TB = preds.shape
    C = num_classes

    # Mask for padded tail columns of the last (partial) block.
    col = jax.lax.broadcasted_iota(jnp.int32, (1, TB), 1) + i * block_b
    valid = col < total_b                            # (1, TB)

    # --- NLLLoss (mean over the *global* batch): -sum_b preds[tgt[b], b] / B ---
    row = jax.lax.broadcasted_iota(jnp.int32, (W, TB), 0)
    onehot = (row == cls) & (row < C) & valid        # one-hot select of preds[tgt[b], b]
    ce_sum = jnp.sum(jnp.where(onehot, preds, 0.0))

    # --- MSELoss(reduce=False).sum(): squared error over the 2 activity rows ---
    diff = preds[C:C + 2, :] - act_tgt               # (2, TB)
    act_sum = jnp.sum(jnp.where(valid, diff * diff, 0.0))

    acc_ref[0, 0] += (-ce_sum / total_b) + activity_weight * act_sum

    @pl.when(i == pl.num_programs(0) - 1)
    def _():
        out_ref[0, 0] = acc_ref[0, 0]


def _separate_kernel(pred_ref, act_tgt_ref, out_ref, *, num_classes):
    preds = pred_ref[...].astype(jnp.float32)        # (W, TB)
    act_tgt = act_tgt_ref[...].astype(jnp.float32)   # (2, TB)
    diff = preds[num_classes:num_classes + 2, :] - act_tgt
    out_ref[...] = (diff * diff).astype(out_ref.dtype)   # lane-dense (2, TB)


def criticality_loss(predictions, targets, activity_weight=1.0, return_separate_loss=False):
    """Pallas implementation of CriticalityLoss.forward.

    predictions: (B, C+2) — C class log-probs followed by 2 activity predictions.
    targets:     (B, 3)   — column 0 is the class index, columns 1:3 activity targets.
    """
    B, W = predictions.shape
    C = W - 2

    # Layout plumbing only — no dtype upcast in the wrapper (kernels cast in-vreg).
    pred_t = predictions.T                 # (W, B): batch on the lane axis
    act_tgt_t = targets[:, 1:3].T          # (2, B)

    if B <= _SINGLE_BLOCK_MAX_B:
        tb, n_blocks = B, 1
    else:
        tb, n_blocks = _LANE_TILE, pl.cdiv(B, _LANE_TILE)

    params = pltpu.CompilerParams(
        dimension_semantics=("parallel",) if return_separate_loss else ("arbitrary",),
        vmem_limit_bytes=32 * 1024 * 1024,   # tiles are tiny; explicit & safe on v5e/v6e/v7x
    )

    if return_separate_loss:
        out = pl.pallas_call(
            functools.partial(_separate_kernel, num_classes=C),
            out_shape=jax.ShapeDtypeStruct((2, B), jnp.float32),
            grid=(n_blocks,),
            in_specs=[
                pl.BlockSpec((W, tb), lambda i: (0, i)),
                pl.BlockSpec((2, tb), lambda i: (0, i)),
            ],
            out_specs=pl.BlockSpec((2, tb), lambda i: (0, i)),
            compiler_params=params,
        )(pred_t, act_tgt_t)
        return out.T                        # (B, 2) — same layout as the torch module

    # Class indices as a separate int32 array; truncation matches torch's `.long()`.
    cls_idx = targets[:, 0].astype(jnp.int32).reshape(1, B)

    out = pl.pallas_call(
        functools.partial(
            _loss_kernel,
            num_classes=C,
            total_b=B,
            block_b=tb,
            activity_weight=float(activity_weight),
        ),
        out_shape=jax.ShapeDtypeStruct((1, 1), jnp.float32),
        grid=(n_blocks,),
        in_specs=[
            pl.BlockSpec((W, tb), lambda i: (0, i)),
            pl.BlockSpec((1, tb), lambda i: (0, i)),
            pl.BlockSpec((2, tb), lambda i: (0, i)),
        ],
        out_specs=pl.BlockSpec(memory_space=pltpu.MemorySpace.SMEM),
        scratch_shapes=[pltpu.SMEM((1, 1), jnp.float32)],
        compiler_params=params,
    )(pred_t, cls_idx, act_tgt_t)
    return out[0, 0]


def _reference_loss(predictions, targets, activity_weight=1.0):
    """Pure-JAX reference mirroring the PyTorch module."""
    C = predictions.shape[1] - 2
    cls_idx = targets[:, 0].astype(jnp.int32)
    ce = -jnp.mean(jnp.take_along_axis(predictions[:, :C], cls_idx[:, None], axis=1))
    act = jnp.sum((predictions[:, C:] - targets[:, 1:]) ** 2)
    return ce + activity_weight * act


if __name__ == "__main__":
    key = jax.random.PRNGKey(0)

    def make_inputs(k, batch, num_classes):
        k1, k2, k3, k4 = jax.random.split(k, 4)
        logits = jax.random.normal(k1, (batch, num_classes), dtype=jnp.float32)
        log_probs = jax.nn.log_softmax(logits, axis=-1)
        act_preds = jax.random.normal(k2, (batch, 2), dtype=jnp.float32)
        predictions = jnp.concatenate([log_probs, act_preds], axis=1)     # (B, C+2)
        cls_tgt = jax.random.randint(k3, (batch, 1), 0, num_classes).astype(jnp.float32)
        act_tgt = jax.random.normal(k4, (batch, 2), dtype=jnp.float32)
        targets = jnp.concatenate([cls_tgt, act_tgt], axis=1)             # (B, 3)
        return predictions, targets

    activity_weight = 0.5
    k_small, k_big = jax.random.split(key)

    # Small shape (single full-array block path).
    preds_s, tgts_s = make_inputs(k_small, 8, 6)
    loss_s = jax.block_until_ready(criticality_loss(preds_s, tgts_s, activity_weight))
    ref_s = _reference_loss(preds_s, tgts_s, activity_weight)
    assert jnp.allclose(loss_s, ref_s, atol=1e-5, rtol=1e-5), (loss_s, ref_s)

    # Separate-loss branch (lane-dense (2, B) kernel output, untransposed in wrapper).
    sep = jax.block_until_ready(
        criticality_loss(preds_s, tgts_s, activity_weight, return_separate_loss=True))
    sep_ref = (preds_s[:, -2:] - tgts_s[:, 1:]) ** 2
    assert jnp.allclose(sep, sep_ref, atol=1e-5, rtol=1e-5)

    # Larger batch exercising the tiled, masked, accumulator grid path (partial last tile).
    preds_b, tgts_b = make_inputs(k_big, 4196, 6)
    loss_b = jax.block_until_ready(criticality_loss(preds_b, tgts_b, activity_weight))
    ref_b = _reference_loss(preds_b, tgts_b, activity_weight)
    assert jnp.allclose(loss_b, ref_b, atol=1e-4, rtol=1e-4), (loss_b, ref_b)

    print("KERNEL_OK")
</pallas_src>

<mosaic_0001>
module attributes {stable_mosaic.version = 11 : i64} {
  func.func @_loss_kernel(%arg0: i32, %arg1: memref<8x8xf32, #tpu.memory_space<vmem>>, %arg2: memref<1x8xi32, #tpu.memory_space<vmem>>, %arg3: memref<2x8xf32, #tpu.memory_space<vmem>>, %arg4: memref<1x1xf32, #tpu.memory_space<smem>>, %arg5: memref<1x1xf32, #tpu.memory_space<smem>>) attributes {dimension_semantics = [#tpu.dimension_semantics<arbitrary>], iteration_bounds = array<i64: 1>, scalar_prefetch = 0 : i64, scratch_operands = 1 : i64, tpu.core_type = #tpu.core_type<tc>, window_params = [{transform_indices = @transform_0, window_bounds = array<i64: 8, 8>}, {transform_indices = @transform_1, window_bounds = array<i64: 1, 8>}, {transform_indices = @transform_2, window_bounds = array<i64: 2, 8>}, {transform_indices = @transform_3, window_bounds = array<i64: 1, 1>}]} {
    %c0_i32 = arith.constant 0 : i32
    %0 = arith.cmpi eq, %arg0, %c0_i32 : i32
    %1 = arith.extui %0 : i1 to i32
    %c0_i32_0 = arith.constant 0 : i32
    %2 = arith.cmpi ne, %1, %c0_i32_0 : i32
    scf.if %2 {
      %cst_19 = arith.constant 0.000000e+00 : f32
      %c0_20 = arith.constant 0 : index
      %c0_21 = arith.constant 0 : index
      %47 = memref.load %arg5[%c0_20, %c0_21] : memref<1x1xf32, #tpu.memory_space<smem>>
      memref.store %cst_19, %arg5[%c0_20, %c0_21] : memref<1x1xf32, #tpu.memory_space<smem>>
    } else {
    }
    %c0 = arith.constant 0 : index
    %c0_1 = arith.constant 0 : index
    %3 = vector.load %arg1[%c0, %c0_1] : memref<8x8xf32, #tpu.memory_space<vmem>>, vector<8x8xf32>
    %c0_2 = arith.constant 0 : index
    %c0_3 = arith.constant 0 : index
    %4 = vector.load %arg2[%c0_2, %c0_3] : memref<1x8xi32, #tpu.memory_space<vmem>>, vector<1x8xi32>
    %c0_4 = arith.constant 0 : index
    %c0_5 = arith.constant 0 : index
    %5 = vector.load %arg3[%c0_4, %c0_5] : memref<2x8xf32, #tpu.memory_space<vmem>>, vector<2x8xf32>
    %6 = tpu.iota {dimensions = array<i32: 1>} : vector<1x8xi32>
    %c8_i32 = arith.constant 8 : i32
    %7 = arith.muli %arg0, %c8_i32 : i32
    %8 = vector.broadcast %7 : i32 to vector<1x8xi32>
    %9 = arith.addi %6, %8 : vector<1x8xi32>
    %c8_i32_6 = arith.constant 8 : i32
    %10 = vector.broadcast %c8_i32_6 : i32 to vector<1x8xi32>
    %11 = arith.cmpi slt, %9, %10 : vector<1x8xi32>
    %12 = tpu.iota {dimensions = array<i32: 0>} : vector<8x8xi32>
    %13 = vector.broadcast %4 : vector<1x8xi32> to vector<8x8xi32>
    %14 = arith.cmpi eq, %12, %13 : vector<8x8xi32>
    %c6_i32 = arith.constant 6 : i32
    %15 = vector.broadcast %c6_i32 : i32 to vector<8x8xi32>
    %16 = arith.cmpi slt, %12, %15 : vector<8x8xi32>
    %17 = arith.andi %14, %16 : vector<8x8xi1>
    %18 = vector.broadcast %11 : vector<1x8xi1> to vector<8x8xi1>
    %19 = arith.andi %17, %18 : vector<8x8xi1>
    %cst = arith.constant 0.000000e+00 : f32
    %20 = vector.broadcast %cst : f32 to vector<8x8xf32>
    %21 = arith.select %19, %3, %20 : vector<8x8xi1>, vector<8x8xf32>
    %22 = vector.shape_cast %21 : vector<8x8xf32> to vector<1x8x8xf32>
    %cst_7 = arith.constant dense<0.000000e+00> : vector<1xf32>
    %23 = vector.multi_reduction <add>, %22, %cst_7 [1, 2] : vector<1x8x8xf32> to vector<1xf32>
    %24 = vector.shape_cast %23 : vector<1xf32> to vector<1x1x1xf32>
    %25 = vector.extract %24[0, 0, 0] : f32 from vector<1x1x1xf32>
    %26 = vector.extract_strided_slice %3 {offsets = [6, 0], sizes = [2, 8], strides = [1, 1]} : vector<8x8xf32> to vector<2x8xf32>
    %27 = arith.subf %26, %5 : vector<2x8xf32>
    %28 = arith.mulf %27, %27 : vector<2x8xf32>
    %cst_8 = arith.constant 0.000000e+00 : f32
    %29 = vector.shape_cast %11 : vector<1x8xi1> to vector<1x8xi1>
    %30 = vector.broadcast %29 : vector<1x8xi1> to vector<2x8xi1>
    %31 = vector.broadcast %cst_8 : f32 to vector<2x8xf32>
    %32 = arith.select %30, %28, %31 : vector<2x8xi1>, vector<2x8xf32>
    %33 = vector.shape_cast %32 : vector<2x8xf32> to vector<1x2x8xf32>
    %cst_9 = arith.constant dense<0.000000e+00> : vector<1xf32>
    %34 = vector.multi_reduction <add>, %33, %cst_9 [1, 2] : vector<1x2x8xf32> to vector<1xf32>
    %35 = vector.shape_cast %34 : vector<1xf32> to vector<1x1x1xf32>
    %36 = vector.extract %35[0, 0, 0] : f32 from vector<1x1x1xf32>
    %c0_10 = arith.constant 0 : index
    %c0_11 = arith.constant 0 : index
    %37 = memref.load %arg5[%c0_10, %c0_11] : memref<1x1xf32, #tpu.memory_space<smem>>
    %cst_12 = arith.constant 0.000000e+00 : f32
    %38 = arith.subf %cst_12, %25 : f32
    %cst_13 = arith.constant 8.000000e+00 : f32
    %39 = arith.divf %38, %cst_13 : f32
    %cst_14 = arith.constant 5.000000e-01 : f32
    %40 = arith.mulf %cst_14, %36 : f32
    %41 = arith.addf %39, %40 : f32
    %42 = arith.addf %37, %41 : f32
    %c0_15 = arith.constant 0 : index
    %c0_16 = arith.constant 0 : index
    %43 = memref.load %arg5[%c0_15, %c0_16] : memref<1x1xf32, #tpu.memory_space<smem>>
    memref.store %42, %arg5[%c0_15, %c0_16] : memref<1x1xf32, #tpu.memory_space<smem>>
    %c0_i32_17 = arith.constant 0 : i32
    %44 = arith.cmpi eq, %arg0, %c0_i32_17 : i32
    %45 = arith.extui %44 : i1 to i32
    %c0_i32_18 = arith.constant 0 : i32
    %46 = arith.cmpi ne, %45, %c0_i32_18 : i32
    scf.if %46 {
      %c0_19 = arith.constant 0 : index
      %c0_20 = arith.constant 0 : index
      %47 = memref.load %arg5[%c0_19, %c0_20] : memref<1x1xf32, #tpu.memory_space<smem>>
      %c0_21 = arith.constant 0 : index
      %c0_22 = arith.constant 0 : index
      %48 = memref.load %arg4[%c0_21, %c0_22] : memref<1x1xf32, #tpu.memory_space<smem>>
      memref.store %47, %arg4[%c0_21, %c0_22] : memref<1x1xf32, #tpu.memory_space<smem>>
    } else {
    }
    return
  }
  func.func @transform_0(%arg0: i32) -> (i32, i32) {
    %c0_i32 = arith.constant 0 : i32
    %c0_i32_0 = arith.constant 0 : i32
    return %c0_i32, %arg0 : i32, i32
  }
  func.func @transform_1(%arg0: i32) -> (i32, i32) {
    %c0_i32 = arith.constant 0 : i32
    %c0_i32_0 = arith.constant 0 : i32
    return %c0_i32, %arg0 : i32, i32
  }
  func.func @transform_2(%arg0: i32) -> (i32, i32) {
    %c0_i32 = arith.constant 0 : i32
    %c0_i32_0 = arith.constant 0 : i32
    return %c0_i32, %arg0 : i32, i32
  }
  func.func @transform_3(%arg0: i32) -> (i32, i32) {
    %c0_i32 = arith.constant 0 : i32
    %c0_i32_0 = arith.constant 0 : i32
    %c0_i32_1 = arith.constant 0 : i32
    return %c0_i32, %c0_i32_0 : i32, i32
  }
}

</mosaic_0001>

<bundles_post_ra>
// kernel: tpu_custom_call.1
= control target key start
LH: loop header
LB: loop body
LE: loop exit
PB: predicated region body
PF: predicated region fallthrough
CT: control target
= control target key end

     0   :  { %8 = vsyncpa [#allocation4], 0  ;;  %s211_s0 = inlined_call_operand.hbm [shape: f32[8,8], index: 0, kind: input, shape index: {}]   ;;  %s212_s1 = inlined_call_operand.vmem [shape: s32[1,8], index: 1, kind: input, shape index: {}]   ;;  %s213_s2 = inlined_call_operand.vmem [shape: f32[2,8], index: 2, kind: input, shape index: {}]   ;;  %s214_s3 = inlined_call_operand.hbm [shape: f32[1,1], index: 3, kind: output, shape index: {}]  }
   0x1   :  { %9 = vsyncpa [#allocation5], 0  ;;  %s159_s12 = smov [#allocation3]   ;;  %s123_s16 = scalar_lea.hbm %s211_s0, 128 }
   0x2   :  { %s16_s13 = sshll.u32 %s159_s12, 4  ;;  %p124_p0 = scmp.ne.s32.totalorder %s211_s0, %s123_s16  ;;  %s17_s13 = int_to_ptr.vmem [resolvable:$true] %s16_s13 }
   0x3   :  { %p127_p1 = scmp.lt.u32.totalorder %s123_s16, %s211_s0 }
   0x5   :  { %p129_p2 = pnand %p127_p1, %p124_p0 }
   0x7   :  { %132 = shalt.err (!%p129_p2)
}
   0x8   :  { %s133_s21 = scalar_lea.vmem %s17_s13, 128  ;;  %p138_p4 = scmp.lt.s32.totalorder %s17_s13, %s17_s13 }
   0x9   :  { %p134_p3 = scmp.ne.s32.totalorder %s17_s13, %s133_s21  ;;  %p139_p5 = scmp.lt.s32.totalorder %s133_s21, %s133_s21 }
   0xb   :  { %p140_p6 = por %p139_p5, %p138_p4 }
   0xd   :  { %p141_p7 = pnand %p140_p6, %p134_p3 }
   0xf   :  { %144 = shalt.err (!%p141_p7)
}
  0x10   :  { %19 = dma.hbm_to_vmem [thread:$0]  %s211_s0, 128, %s17_s13, [#allocation4]  }
  0x11   :  { %155 = dma.done.wait [#allocation4], 128  }
  0x12   :  { %156 = vsyncadd [#allocation4], 4294967168  ;;  %v36_v0 = vlaneseq  ;;  %v33_v3 = vld [vmem:[#allocation3] sm:$0xff]  ;;  %vm55_vm4 = vcmask 64512   ;;  %vm75_vm6 = vcmask 58368   ;;  %s145_s6 = scalar_lea.hbm %s214_s3, 16 }
  0x13   :  { %v116_v4 = vld [vmem:[%s212_s1] ss:$0 sm:$0xff]  ;;  %p146_p8 = scmp.ne.s32.totalorder %s214_s3, %s145_s6  ;;  %p149_p9 = scmp.lt.u32.totalorder %s145_s6, %s214_s3 }
  0x14   :  { %v43_v1 = vshrl.u32 %v36_v0, 7  ;;  %v37_v2 = vand.u32 127, %v36_v0  ;;  %v35_v5 = vld [vmem:[%s213_s2] sm:$0x3] }
  0x15   :  { %v67_v6 = vrot.slane %v35_v5, 2  ;;  %p151_p10 = pnand %p149_p9, %p146_p8 }
  0x16   :  { %vm49_vm0 = vcmp.lt.s32.totalorder %v43_v1, 6  ;;  %vm41_vm1 = vcmp.lt.s32.totalorder %v37_v2, 8  ;;  %vm48_vm2 = vcmp.eq.s32.totalorder %v43_v1, %v116_v4 }
  0x17   :  { %vm50_vm3 = vmand %vm48_vm2, %vm49_vm0  ;;  %v69_v7 = vsub.f32 %v33_v3, %v67_v6 }
  0x18   :  { %vm53_vm5 = vmand %vm50_vm3, %vm41_vm1 }
  0x19   :  { %v54_v8 = vsel %vm53_vm5, %v33_v3, 0.0  ;;  %v70_v10 = vmul.f32 %v69_v7, %v69_v7 }
  0x1a   :  { %v56_v9 = vsel %vm55_vm4, %v54_v8, 0.0 }
  0x1b   :  { %57 = vadd.xlane.f32.xlu0 %v56_v9  ;;  %v71_v11 = vsel %vm41_vm1, %v70_v10, 0.0 }
  0x1c   :  { %v73_v12 = vrot.slane %v71_v11, 6 }
  0x1e   :  { %v76_v13 = vsel %vm75_vm6, %v73_v12, 0.0 }
  0x1f   :  { %77 = vadd.xlane.f32.xlu0 %v76_v13 }
  0xa8   :  { %v58_v14 = vpop.xlane.xlu0 %57 }
  0xa9   :  { %v59_v15 = vrot.slane %v58_v14, 4 }
  0xab   :  { %v60_v16 = vadd.f32 %v59_v15, %v58_v14 }
  0xac   :  { %v78_v18 = vpop.xlane.xlu0 %77 }
  0xad   :  { %v61_v17 = vrot.slane %v60_v16, 2  ;;  %v79_v19 = vrot.slane %v78_v18, 4 }
  0xaf   :  { %v62_v20 = vadd.f32 %v61_v17, %v60_v16  ;;  %v80_v21 = vadd.f32 %v79_v19, %v78_v18 }
  0xb1   :  { %v63_v22 = vrot.slane %v62_v20, 1  ;;  %v81_v23 = vrot.slane %v80_v21, 2 }
  0xb3   :  { %v64_v24 = vadd.f32 %v63_v22, %v62_v20  ;;  %v82_v25 = vadd.f32 %v81_v23, %v80_v21 }
  0xb5   :  { %117 = vpush %v64_v24  ;;  %v83_v26 = vrot.slane %v82_v25, 1 }
  0xb7   :  { %v84_v27 = vadd.f32 %v83_v26, %v82_v25 }
  0xb9   :  { %119 = vpush %v84_v27 }
  0xe6   :  { %s118_s0 = spop %117 }
  0xe7   :  { %s87_s1 = ssub.f32 0.0, %s118_s0 }
  0xe9   :  { %s90_s2 = smul.f32 0.125, %s87_s1 }
  0xea   :  { %s120_s28 = spop %119 }
  0xeb   :  { %s91_s29 = smul.f32 0.5, %s120_s28 }
  0xed   :  { %s92_s30 = sadd.f32 %s91_s29, %s90_s2 }
  0xef   :  { %101 = sst [smem:[#allocation6]] %s92_s30 }
  0xf0   :  { %154 = shalt.err (!%p151_p10)
}
  0xf1   :  { %s160_s11 = smov [#allocation6]  }
  0xf2   :  { %109 = dma.smem_to_hbm %s160_s11, 16, %s214_s3, [#allocation5]  }
  0xf3   :  { %157 = dma.done.wait [#allocation5], 16  }
  0xf4   :  { %158 = vsyncadd [#allocation5], 4294967280 }
  0xf5   :  { %113 = sfence }
  0xf6   :  { %114 = vsyncpa [#allocation4], 1 }
  0xf7   :  { %115 = vsyncpa [#allocation5], 1 }

</bundles_post_ra>
